<compile_context>
chip_gen: v7x
topology: tpu7x:2x2x1
jax: 0.10.0
libtpu: 0.0.40
codegen_flags: <defaults>
</compile_context>

<pallas_src>
import jax
import jax.numpy as jnp
from jax.experimental import pallas as pl
from jax.experimental.pallas import tpu as pltpu


def _mlp_kernel(x_ref, w1_ref, b1_ref, w2_ref, b2_ref, w3_ref, b3_ref, o_ref):
    # Cast the streamed x tile to bf16 in-register (no extra HBM pass); all
    # matmuls accumulate in f32 via preferred_element_type.
    xb = x_ref[...].astype(jnp.bfloat16)

    # fc1: Linear (bf16 x bf16 -> f32 acc) + ReLU.
    h1 = jnp.dot(xb, w1_ref[...], preferred_element_type=jnp.float32) + b1_ref[...]
    h1 = jnp.maximum(h1, 0.0)

    # fc2: Linear (bf16 x bf16 -> f32 acc) + Sigmoid (EUP, f32 -> v5e-safe).
    h2 = jnp.dot(h1.astype(jnp.bfloat16), w2_ref[...],
                 preferred_element_type=jnp.float32) + b2_ref[...]
    h2 = jax.nn.sigmoid(h2)

    # fc3 (hidden -> 1): off the MXU.  VPU multiply + lane reduce; padded w3
    # entries are zero so padded h2 lanes (sigmoid(0)=0.5) contribute nothing.
    out = jnp.sum(h2 * w3_ref[...], axis=-1, keepdims=True) + b3_ref[...]
    o_ref[...] = out.astype(o_ref.dtype)


def _round_up(n, m):
    return ((n + m - 1) // m) * m


def _choose_tile(batch, d_in, itemsize):
    """~4 MiB of x per tile, multiple of 8 rows, capped at 8192 rows."""
    target_bytes = 4 * 1024 * 1024
    tb = (target_bytes // max(1, d_in * itemsize)) // 8 * 8
    tb = max(8, min(int(tb), 8192))
    tb = min(tb, _round_up(batch, 8))
    return tb


def _vmem_limit_bytes(tb, d_in, x_itemsize, param_bytes):
    tile_in = 2 * tb * d_in * x_itemsize                       # double-buffered x
    inter = tb * (128 * 4 + 128 * 2 + 64 * 4 + 64 * 4 + 8)     # h1 f32/bf16, h2, prod, out
    out = 2 * tb * 4
    needed = tile_in + inter + out + 2 * param_bytes
    try:
        phys = int(pltpu.get_tpu_info().vmem_capacity_bytes)
    except Exception:
        phys = 64 * 1024 * 1024
    cap = (phys * 3) // 4                                       # leave headroom
    return int(min(cap, max(32 * 1024 * 1024, 2 * needed)))


def _prepare_params(params):
    """Zero-pad hidden dims to lane-friendly sizes and pre-cast MXU weights to
    bf16.  w3 is handed to the kernel as a padded f32 row (1, h2p)."""
    w1, b1, w2, b2, w3, b3 = params
    d_in, h1 = w1.shape
    h2 = w2.shape[1]
    h1p = _round_up(h1, 128)   # 100 -> 128
    h2p = _round_up(h2, 64)    # 50  -> 64

    w1p = jnp.zeros((d_in, h1p), jnp.bfloat16).at[:, :h1].set(w1.astype(jnp.bfloat16))
    b1p = jnp.zeros((1, h1p), jnp.float32).at[:, :h1].set(b1.reshape(1, -1).astype(jnp.float32))
    w2p = jnp.zeros((h1p, h2p), jnp.bfloat16).at[:h1, :h2].set(w2.astype(jnp.bfloat16))
    b2p = jnp.zeros((1, h2p), jnp.float32).at[:, :h2].set(b2.reshape(1, -1).astype(jnp.float32))
    w3p = jnp.zeros((1, h2p), jnp.float32).at[:, :h2].set(
        w3.reshape(-1).astype(jnp.float32)[None, :])
    b3p = b3.reshape(1, 1).astype(jnp.float32)
    return w1p, b1p, w2p, b2p, w3p, b3p


def tweet2returns_forward(x, params):
    """x: any shape whose trailing dims flatten to embedding_dim1*embedding_dim2.
    Returns (batch, 1) float32."""
    w1 = params[0]
    d_in = w1.shape[0]
    h_mid = params[2].shape[1]  # 50, for cost estimate
    h_top = w1.shape[1]         # 100

    x2d = x.reshape(-1, d_in)   # == torch .view(-1, D1*D2); keep original dtype
    batch = x2d.shape[0]
    itemsize = x2d.dtype.itemsize

    w1p, b1p, w2p, b2p, w3p, b3p = _prepare_params(params)
    padded = (w1p, b1p, w2p, b2p, w3p, b3p)
    param_bytes = sum(int(p.size) * p.dtype.itemsize for p in padded)

    tb = _choose_tile(batch, d_in, itemsize)
    grid = (pl.cdiv(batch, tb),)
    vmem_limit = _vmem_limit_bytes(tb, d_in, itemsize, param_bytes)

    cost = pl.CostEstimate(
        flops=2 * batch * (d_in * h_top + h_top * h_mid + h_mid * 1),
        transcendentals=batch * h_mid,
        bytes_accessed=batch * d_in * itemsize + param_bytes + batch * 4,
    )

    const = lambda i: (0, 0)  # weights/biases stay VMEM-resident across grid steps
    out = pl.pallas_call(
        _mlp_kernel,
        out_shape=jax.ShapeDtypeStruct((batch, 1), jnp.float32),
        grid=grid,
        in_specs=[
            pl.BlockSpec((tb, d_in), lambda i: (i, 0)),   # streamed input tile
            pl.BlockSpec(w1p.shape, const),
            pl.BlockSpec(b1p.shape, const),
            pl.BlockSpec(w2p.shape, const),
            pl.BlockSpec(b2p.shape, const),
            pl.BlockSpec(w3p.shape, const),
            pl.BlockSpec(b3p.shape, const),
        ],
        out_specs=pl.BlockSpec((tb, 1), lambda i: (i, 0)),
        compiler_params=pltpu.CompilerParams(
            dimension_semantics=("parallel",),
            vmem_limit_bytes=vmem_limit,
        ),
        cost_estimate=cost,
    )(x2d, w1p, b1p, w2p, b2p, w3p, b3p)

    return out


def init_params(key, embedding_dim1, embedding_dim2):
    """Deterministic init mirroring the module's __init__ shapes.
    Weights: Xavier-uniform (matches init_weights); biases: PyTorch Linear default."""
    d_in = embedding_dim1 * embedding_dim2
    dims = [(d_in, 100), (100, 50), (50, 1)]
    params = []
    for (fan_in, fan_out) in dims:
        key, kw, kb = jax.random.split(key, 3)
        limit = (6.0 / (fan_in + fan_out)) ** 0.5          # xavier_uniform
        w = jax.random.uniform(kw, (fan_in, fan_out), jnp.float32, -limit, limit)
        bbound = 1.0 / (fan_in ** 0.5)                     # torch Linear bias default
        b = jax.random.uniform(kb, (1, fan_out), jnp.float32, -bbound, bbound)
        params.extend([w, b])
    return tuple(params)


if __name__ == "__main__":
    embedding_dim1, embedding_dim2 = 8, 16   # D = 128
    batch = 2

    key = jax.random.PRNGKey(0)
    key, kx = jax.random.split(key)
    x = jax.random.normal(kx, (batch, embedding_dim1, embedding_dim2), jnp.float32)

    params = init_params(key, embedding_dim1, embedding_dim2)

    out = tweet2returns_forward(x, params)
    jax.block_until_ready(out)
    assert out.shape == (batch, 1), out.shape
    assert bool(jnp.all(jnp.isfinite(out)))

    # Pure-JAX f32 reference (kernel uses bf16 matmul operands with f32
    # accumulation, so tolerance is relaxed accordingly).
    w1, b1, w2, b2, w3, b3 = params
    xr = x.reshape(-1, embedding_dim1 * embedding_dim2).astype(jnp.float32)
    ref = jnp.maximum(xr @ w1 + b1, 0.0)
    ref = jax.nn.sigmoid(ref @ w2 + b2)
    ref = ref @ w3 + b3
    assert jnp.allclose(out, ref, atol=5e-2, rtol=5e-2), (out, ref)

    print("KERNEL_OK")
</pallas_src>

<mosaic_0001>
module attributes {stable_mosaic.version = 11 : i64} {
  func.func @_mlp_kernel(%arg0: i32, %arg1: memref<8x128xf32, #tpu.memory_space<vmem>>, %arg2: memref<128x128xbf16, #tpu.memory_space<vmem>>, %arg3: memref<1x128xf32, #tpu.memory_space<vmem>>, %arg4: memref<128x64xbf16, #tpu.memory_space<vmem>>, %arg5: memref<1x64xf32, #tpu.memory_space<vmem>>, %arg6: memref<1x64xf32, #tpu.memory_space<vmem>>, %arg7: memref<1x1xf32, #tpu.memory_space<vmem>>, %arg8: memref<8x1xf32, #tpu.memory_space<vmem>>) attributes {dimension_semantics = [#tpu.dimension_semantics<parallel>], iteration_bounds = array<i64: 1>, scalar_prefetch = 0 : i64, scratch_operands = 0 : i64, tpu.core_type = #tpu.core_type<tc>, window_params = [{transform_indices = @transform_0, window_bounds = array<i64: 8, 128>}, {pipeline_mode = #tpu.pipeline_mode<synchronous>, transform_indices = @transform_1, window_bounds = array<i64: 128, 128>}, {pipeline_mode = #tpu.pipeline_mode<synchronous>, transform_indices = @transform_2, window_bounds = array<i64: 1, 128>}, {pipeline_mode = #tpu.pipeline_mode<synchronous>, transform_indices = @transform_3, window_bounds = array<i64: 128, 64>}, {pipeline_mode = #tpu.pipeline_mode<synchronous>, transform_indices = @transform_4, window_bounds = array<i64: 1, 64>}, {pipeline_mode = #tpu.pipeline_mode<synchronous>, transform_indices = @transform_5, window_bounds = array<i64: 1, 64>}, {pipeline_mode = #tpu.pipeline_mode<synchronous>, transform_indices = @transform_6, window_bounds = array<i64: 1, 1>}, {transform_indices = @transform_7, window_bounds = array<i64: 8, 1>}]} {
    %c0 = arith.constant 0 : index
    %c0_0 = arith.constant 0 : index
    %0 = vector.load %arg1[%c0, %c0_0] : memref<8x128xf32, #tpu.memory_space<vmem>>, vector<8x128xf32>
    %1 = arith.truncf %0 : vector<8x128xf32> to vector<8x128xbf16>
    %c0_1 = arith.constant 0 : index
    %c0_2 = arith.constant 0 : index
    %2 = vector.load %arg2[%c0_1, %c0_2] : memref<128x128xbf16, #tpu.memory_space<vmem>>, vector<128x128xbf16>
    %cst = arith.constant dense<0.000000e+00> : vector<8x128xf32>
    %3 = tpu.matmul %1, %2, %cst {dimension_numbers = #tpu.dot_dimension_numbers<[1], [0], [0], [1], [0, 0, 1, 1], [], []>} : vector<8x128xbf16>, vector<128x128xbf16>, vector<8x128xf32> -> vector<8x128xf32>
    %c0_3 = arith.constant 0 : index
    %c0_4 = arith.constant 0 : index
    %4 = vector.load %arg3[%c0_3, %c0_4] : memref<1x128xf32, #tpu.memory_space<vmem>>, vector<1x128xf32>
    %5 = vector.broadcast %4 : vector<1x128xf32> to vector<8x128xf32>
    %6 = arith.addf %3, %5 : vector<8x128xf32>
    %cst_5 = arith.constant 0.000000e+00 : f32
    %7 = vector.broadcast %cst_5 : f32 to vector<8x128xf32>
    %8 = arith.maximumf %6, %7 : vector<8x128xf32>
    %9 = arith.truncf %8 : vector<8x128xf32> to vector<8x128xbf16>
    %c0_6 = arith.constant 0 : index
    %c0_7 = arith.constant 0 : index
    %10 = vector.load %arg4[%c0_6, %c0_7] : memref<128x64xbf16, #tpu.memory_space<vmem>>, vector<128x64xbf16>
    %cst_8 = arith.constant dense<0.000000e+00> : vector<8x64xf32>
    %11 = tpu.matmul %9, %10, %cst_8 {dimension_numbers = #tpu.dot_dimension_numbers<[1], [0], [0], [1], [0, 0, 1, 1], [], []>} : vector<8x128xbf16>, vector<128x64xbf16>, vector<8x64xf32> -> vector<8x64xf32>
    %c0_9 = arith.constant 0 : index
    %c0_10 = arith.constant 0 : index
    %12 = vector.load %arg5[%c0_9, %c0_10] : memref<1x64xf32, #tpu.memory_space<vmem>>, vector<1x64xf32>
    %13 = vector.broadcast %12 : vector<1x64xf32> to vector<8x64xf32>
    %14 = arith.addf %11, %13 : vector<8x64xf32>
    %15 = arith.negf %14 : vector<8x64xf32>
    %16 = math.exp %15 : vector<8x64xf32>
    %cst_11 = arith.constant 1.000000e+00 : f32
    %17 = vector.broadcast %cst_11 : f32 to vector<8x64xf32>
    %18 = arith.addf %17, %16 : vector<8x64xf32>
    %19 = arith.divf %17, %18 : vector<8x64xf32>
    %c0_12 = arith.constant 0 : index
    %c0_13 = arith.constant 0 : index
    %20 = vector.load %arg6[%c0_12, %c0_13] : memref<1x64xf32, #tpu.memory_space<vmem>>, vector<1x64xf32>
    %21 = vector.broadcast %20 : vector<1x64xf32> to vector<8x64xf32>
    %22 = arith.mulf %19, %21 : vector<8x64xf32>
    %cst_14 = arith.constant dense<0.000000e+00> : vector<8xf32>
    %23 = vector.multi_reduction <add>, %22, %cst_14 [1] : vector<8x64xf32> to vector<8xf32>
    %24 = vector.shape_cast %23 : vector<8xf32> to vector<8x1xf32>
    %c0_15 = arith.constant 0 : index
    %c0_16 = arith.constant 0 : index
    %25 = vector.load %arg7[%c0_15, %c0_16] : memref<1x1xf32, #tpu.memory_space<vmem>>, vector<1x1xf32>
    %26 = vector.broadcast %25 : vector<1x1xf32> to vector<8x1xf32>
    %27 = arith.addf %24, %26 : vector<8x1xf32>
    %c0_17 = arith.constant 0 : index
    %c0_18 = arith.constant 0 : index
    %28 = vector.load %arg8[%c0_17, %c0_18] : memref<8x1xf32, #tpu.memory_space<vmem>>, vector<8x1xf32>
    tpu.vector_store %arg8[%c0_17, %c0_18], %27 {strides = array<i32>} : memref<8x1xf32, #tpu.memory_space<vmem>>, vector<8x1xf32>,
    return
  }
  func.func @transform_0(%arg0: i32) -> (i32, i32) {
    %c0_i32 = arith.constant 0 : i32
    %c0_i32_0 = arith.constant 0 : i32
    return %arg0, %c0_i32 : i32, i32
  }
  func.func @transform_1(%arg0: i32) -> (i32, i32) {
    %c0_i32 = arith.constant 0 : i32
    %c0_i32_0 = arith.constant 0 : i32
    %c0_i32_1 = arith.constant 0 : i32
    return %c0_i32, %c0_i32_0 : i32, i32
  }
  func.func @transform_2(%arg0: i32) -> (i32, i32) {
    %c0_i32 = arith.constant 0 : i32
    %c0_i32_0 = arith.constant 0 : i32
    %c0_i32_1 = arith.constant 0 : i32
    return %c0_i32, %c0_i32_0 : i32, i32
  }
  func.func @transform_3(%arg0: i32) -> (i32, i32) {
    %c0_i32 = arith.constant 0 : i32
    %c0_i32_0 = arith.constant 0 : i32
    %c0_i32_1 = arith.constant 0 : i32
    return %c0_i32, %c0_i32_0 : i32, i32
  }
  func.func @transform_4(%arg0: i32) -> (i32, i32) {
    %c0_i32 = arith.constant 0 : i32
    %c0_i32_0 = arith.constant 0 : i32
    %c0_i32_1 = arith.constant 0 : i32
    return %c0_i32, %c0_i32_0 : i32, i32
  }
  func.func @transform_5(%arg0: i32) -> (i32, i32) {
    %c0_i32 = arith.constant 0 : i32
    %c0_i32_0 = arith.constant 0 : i32
    %c0_i32_1 = arith.constant 0 : i32
    return %c0_i32, %c0_i32_0 : i32, i32
  }
  func.func @transform_6(%arg0: i32) -> (i32, i32) {
    %c0_i32 = arith.constant 0 : i32
    %c0_i32_0 = arith.constant 0 : i32
    %c0_i32_1 = arith.constant 0 : i32
    return %c0_i32, %c0_i32_0 : i32, i32
  }
  func.func @transform_7(%arg0: i32) -> (i32, i32) {
    %c0_i32 = arith.constant 0 : i32
    %c0_i32_0 = arith.constant 0 : i32
    return %arg0, %c0_i32 : i32, i32
  }
}

</mosaic_0001>

<bundles_post_ra>
// kernel: tpu_custom_call.1
= control target key start
LH: loop header
LB: loop body
LE: loop exit
PB: predicated region body
PF: predicated region fallthrough
CT: control target
= control target key end

     0   :  { %s531_s0 = inlined_call_operand.vmem [shape: f32[2,128], index: 0, kind: input, shape index: {}]   ;;  %s532_s1 = inlined_call_operand.vmem [shape: bf16[128,128], index: 1, kind: input, shape index: {}]   ;;  %s533_s2 = inlined_call_operand.vmem [shape: f32[1,128], index: 2, kind: input, shape index: {}]   ;;  %s534_s3 = inlined_call_operand.vmem [shape: bf16[128,64], index: 3, kind: input, shape index: {}]   ;;  %s535_s4 = inlined_call_operand.vmem [shape: f32[1,64], index: 4, kind: input, shape index: {}]   ;;  %s536_s5 = inlined_call_operand.vmem [shape: f32[1,64], index: 5, kind: input, shape index: {}]   ;;  %s537_s6 = inlined_call_operand.<no memory space> [shape: f32[1,1], index: 6, kind: input, shape index: {}]   ;;  %s538_s7 = inlined_call_operand.vmem [shape: f32[2,1], index: 7, kind: output, shape index: {}]  }
   0x1   :  { %v12_v0 = vstv %s537_s6 }
   0x2   :  { %13 = vst [vmem:[#allocation2] sm:$0x1] %v12_v0 }
   0x3   :  { %v403_v1 = vld [vmem:[%s532_s1] sm:$0xff]   ;;  %v423_v2 = vmov 0.0   ;;  %v404_v3 = vld [vmem:[%s532_s1 + $0x8] sm:$0xff]   ;;  %vm424_vm0 = vmmov 0   ;;  %v405_v4 = vld [vmem:[%s532_s1 + $0x10] sm:$0xff]   ;;  %vm269_vm1 = vcmask 523264  }
   0x4   :  { %361 = vmatprep.subr.bf16.mxu0 %v423_v2  ;;  %381 = vmatprep.subr.bf16.mxu1 %v423_v2  ;;  %v411_v5 = vld [vmem:[%s534_s3] sm:$0xff]   ;;  %v406_v6 = vld [vmem:[%s532_s1 + $0x18] sm:$0xff]   ;;  %v412_v7 = vld [vmem:[%s534_s3 + $0x8] sm:$0xff]   ;;  %vm281_vm2 = vcmask 7168  }
   0x5   :  { %362 = vmatpush3.bf16.msra.mxu0 %v403_v1  ;;  %377 = vmatprep.mubr.msk.bf16.mxu0 %vm424_vm0, %v423_v2  ;;  %v407_v8 = vld [vmem:[%s532_s1 + $0x20] sm:$0xff]   ;;  %v413_v9 = vld [vmem:[%s534_s3 + $0x10] sm:$0xff]   ;;  %v408_v10 = vld [vmem:[%s532_s1 + $0x28] sm:$0xff]  }
   0x6   :  { %363 = vmatprep.subr.bf16.mxu0 %v423_v2  ;;  %397 = vmatprep.mubr.msk.bf16.mxu1 %vm424_vm0, %v423_v2  ;;  %v414_v11 = vld [vmem:[%s534_s3 + $0x18] sm:$0xff]   ;;  %v409_v12 = vld [vmem:[%s532_s1 + $0x30] sm:$0xff]   ;;  %v415_v13 = vld [vmem:[%s534_s3 + $0x20] sm:$0xff]  }
   0x7   :  { %382 = vmatpush3.bf16.msra.mxu1 %v411_v5  ;;  %v410_v14 = vld [vmem:[%s532_s1 + $0x38] sm:$0xff]   ;;  %v29_v15 = vld [vmem:[%s531_s0] sm:$0xff]  ;;  %v416_v16 = vld [vmem:[%s534_s3 + $0x28] sm:$0xff]  }
   0x8   :  { %383 = vmatprep.subr.bf16.mxu1 %v423_v2  ;;  %v30_v17 = vpack.c.bf16 %v29_v15, %v29_v15  ;;  %v417_v18 = vld [vmem:[%s534_s3 + $0x30] sm:$0xff]   ;;  %v418_v19 = vld [vmem:[%s534_s3 + $0x38] sm:$0xff]   ;;  %v322_v20 = vld [vmem:[%s533_s2] ss:$0 sm:$0xff] }
   0x9   :  { %364 = vmatpush3.bf16.msra.mxu0 %v404_v3  ;;  %v331_v28 = vld [vmem:[%s535_s4] ss:$0 sm:$0xff] }
   0xa   :  { %365 = vmatprep.subr.bf16.mxu0 %v423_v2  ;;  %v341_v37 = vld [vmem:[%s536_s5] ss:$0 sm:$0xff] }
   0xb   :  { %384 = vmatpush3.bf16.msra.mxu1 %v412_v7  ;;  %v342_v41 = vld [vmem:[#allocation2] ss:$0 sm:$0xff] }
   0xc   :  { %385 = vmatprep.subr.bf16.mxu1 %v423_v2 }
   0xd   :  { %366 = vmatpush3.bf16.msra.mxu0 %v405_v4 }
   0xe   :  { %367 = vmatprep.subr.bf16.mxu0 %v423_v2 }
   0xf   :  { %386 = vmatpush3.bf16.msra.mxu1 %v413_v9 }
  0x10   :  { %387 = vmatprep.subr.bf16.mxu1 %v423_v2 }
  0x11   :  { %368 = vmatpush3.bf16.msra.mxu0 %v406_v6 }
  0x12   :  { %369 = vmatprep.subr.bf16.mxu0 %v423_v2 }
  0x13   :  { %388 = vmatpush3.bf16.msra.mxu1 %v414_v11 }
  0x14   :  { %389 = vmatprep.subr.bf16.mxu1 %v423_v2 }
  0x15   :  { %370 = vmatpush3.bf16.msra.mxu0 %v407_v8 }
  0x16   :  { %371 = vmatprep.subr.bf16.mxu0 %v423_v2 }
  0x17   :  { %390 = vmatpush3.bf16.msra.mxu1 %v415_v13 }
  0x18   :  { %391 = vmatprep.subr.bf16.mxu1 %v423_v2 }
  0x19   :  { %372 = vmatpush3.bf16.msra.mxu0 %v408_v10 }
  0x1a   :  { %373 = vmatprep.subr.bf16.mxu0 %v423_v2 }
  0x1b   :  { %392 = vmatpush3.bf16.msra.mxu1 %v416_v16 }
  0x1c   :  { %393 = vmatprep.subr.bf16.mxu1 %v423_v2 }
  0x1d   :  { %374 = vmatpush3.bf16.msra.mxu0 %v409_v12 }
  0x1e   :  { %375 = vmatprep.subr.bf16.mxu0 %v423_v2 }
  0x1f   :  { %394 = vmatpush3.bf16.msra.mxu1 %v417_v18 }
  0x20   :  { %395 = vmatprep.subr.bf16.mxu1 %v423_v2 }
  0x21   :  { %376 = vmatpush3.bf16.msra.mxu0 %v410_v14 }
  0x23   :  { %396 = vmatpush3.bf16.msra.mxu1 %v418_v19 }
  0x24   :  { %378 = vmatmul.mubr.bf16.vlgmr.msra.gmra.mrb[0].mxu0 %v30_v17 }
  0xf7   :  { %v136_v21 = vpop.f32.mrb[0].mxu0 }
  0xf8   :  { %v137_v22 = vadd.f32 %v322_v20, %v136_v21  ;;  %v379_v23 = vpop.f32.mrb[1].mxu0 }
  0xf9   :  { %v139_v24 = vpop.f32.mrb[2].mxu0 }
  0xfa   :  { %v142_v25 = vmax.f32 %v137_v22, 0.0  ;;  %v380_v26 = vpop.f32.mrb[3].mxu0 }
  0xfc   :  { %v143_v27 = vpack.c.bf16 %v142_v25, %v142_v25 }
  0xfe   :  { %398 = vmatmul.mubr.bf16.vlgmr.msra.gmra.mrb[0].mxu1 %v143_v27 }
 0x1d1   :  { %v249_v29 = vpop.f32.mrb[0].mxu1 }
 0x1d2   :  { %v250_v30 = vadd.f32 %v331_v28, %v249_v29  ;;  %v399_v31 = vpop.f32.mrb[1].mxu1 }
 0x1d3   :  { %v252_v32 = vpop.f32.mrb[2].mxu1 }
 0x1d4   :  { %v340_v33 = vmul.f32 -1.442695, %v250_v30  ;;  %v400_v34 = vpop.f32.mrb[3].mxu1 }
 0x1d6   :  { %419 = vpow2.f32 %v340_v33 }
 0x1e0   :  { %v420_v35 = vpop.eup %419 }
 0x1e1   :  { %v258_v36 = vadd.f32 1.0, %v420_v35 }
 0x1e3   :  { %421 = vrcp.f32 %v258_v36 }
 0x1ed   :  { %v422_v38 = vpop.eup %421 }
 0x1ee   :  { %v268_v39 = vmul.f32 %v422_v38, %v341_v37 }
 0x1f0   :  { %v270_v40 = vsel %vm269_vm1, %v268_v39, 0.0 }
 0x1f1   :  { %271 = vadd.xlane.f32.xlu0 %v270_v40 }
 0x27e   :  { %v272_v42 = vpop.xlane.xlu0 %271 }
 0x27f   :  { %v280_v43 = vadd.f32 %v342_v41, %v272_v42 }
 0x281   :  { %282 = vst.msk [vmem:[#allocation3] sm:$0xff] %vm281_vm2, %v280_v43 }
 0x288   :  { %v300_v44 = vld [vmem:[#allocation3] sm:$0x3] }
 0x289   :  { %301 = vst [vmem:[%s538_s7] sm:$0x3] %v300_v44 }

</bundles_post_ra>
